<compile_context>
chip_gen: v6e
topology: v6e:2x2x1
jax: 0.10.0
libtpu: 0.0.40
codegen_flags: <defaults>
</compile_context>

<pallas_src>
import jax
import jax.numpy as jnp
from jax.experimental import pallas as pl
from jax.experimental.pallas import tpu as pltpu

LANE = 128
SUBLANE = 8


def _round_up(x, m):
    return pl.cdiv(x, m) * m


def _mlp_kernel(x_ref, w1_ref, b1_ref, w2_ref, b2_ref, w3_ref, b3_ref, o_ref):
    # Layer 1: Linear + ReLU (K=4, N padded to 128 lanes).
    h = jnp.dot(x_ref[...], w1_ref[...], preferred_element_type=jnp.float32)
    h = jnp.maximum(h + b1_ref[...], 0.0)
    # Layer 2: Linear + ReLU (lane-dense 128-wide operands).
    h = jnp.dot(h, w2_ref[...], preferred_element_type=jnp.float32)
    h = jnp.maximum(h + b2_ref[...], 0.0)
    # Output layer: Linear, no activation. Matmul against lane-padded W3/b3 for the
    # MXU, but only the real out_dim columns are stored (narrow HBM writeback).
    y = jnp.dot(h, w3_ref[...], preferred_element_type=jnp.float32) + b3_ref[...]
    o_ref[...] = y[:, : o_ref.shape[-1]]


def _pad_to(a, shape):
    pads = [(0, s - d) for d, s in zip(a.shape, shape)]
    return jnp.pad(a, pads)


def prepare_params(params):
    """One-time prep (hoisted out of the per-call path): transpose PyTorch
    weights W=[out,in] -> [in,out] and zero-pad every matmul width to a
    multiple of 128 lanes (MXU/VMEM friendly)."""
    (w1, b1), (w2, b2), (w3, b3) = params["l1"], params["l2"], params["l3"]
    in0 = w1.shape[1]
    h1, h2, out_dim = w1.shape[0], w2.shape[0], w3.shape[0]
    h1p = _round_up(h1, LANE)
    h2p = _round_up(h2, LANE)
    outp = _round_up(out_dim, LANE)

    weights = (
        _pad_to(w1.T.astype(jnp.float32), (in0, h1p)),
        _pad_to(b1.astype(jnp.float32)[None, :], (1, h1p)),
        _pad_to(w2.T.astype(jnp.float32), (h1p, h2p)),
        _pad_to(b2.astype(jnp.float32)[None, :], (1, h2p)),
        _pad_to(w3.T.astype(jnp.float32), (h2p, outp)),
        _pad_to(b3.astype(jnp.float32)[None, :], (1, outp)),
    )
    return {"weights": weights, "out_dim": out_dim}


def _vmem_budget_bytes():
    """Generation-aware VMEM budget: half of physical VMEM (v5e/v6e 128 MiB -> 64 MiB,
    v7x 64 MiB -> 32 MiB), clamped to [32, 64] MiB, safe fallback if query fails."""
    try:
        cap = int(pltpu.get_tpu_info().vmem_capacity_bytes)
    except Exception:
        cap = 64 * 1024 * 1024
    return max(32 * 1024 * 1024, min(cap // 2, 64 * 1024 * 1024))


def build_network_forward(x, prep, *, block_batch=8192):
    """x: [batch, 4] float32. prep: output of prepare_params. Returns [batch, out_dim]."""
    w1, b1, w2, b2, w3, b3 = prep["weights"]
    out_dim = prep["out_dim"]

    batch, in_dim = x.shape
    assert in_dim == w1.shape[0], "input feature dim does not match prepared weights"
    h1p, h2p = w1.shape[1], w2.shape[1]
    outp_lanes = w3.shape[1]

    # Per-row VMEM cost of one streamed tile (f32, double-buffered x/out blocks,
    # lane-padded to 128 in VMEM, plus the two hidden activations).
    bytes_per_row = 4 * (2 * LANE + 2 * outp_lanes + h1p + h2p)
    budget = _vmem_budget_bytes()
    tb_cap = max(SUBLANE, ((budget - (4 << 20)) // bytes_per_row) // SUBLANE * SUBLANE)

    # Batch tile: multiple of 8 sublanes (block_batch itself is rounded up so odd
    # user values like 100 stay legal), capped by the VMEM budget.
    block_batch = max(SUBLANE, _round_up(int(block_batch), SUBLANE))
    tb = min(block_batch, _round_up(batch, SUBLANE), tb_cap)
    # Guarantee >=2 grid steps for non-tiny batches so both v7x TensorCores get work
    # (harmless single extra ~0.35us step on v5e/v6e).
    if batch >= 256 and pl.cdiv(batch, tb) == 1:
        tb = _round_up(pl.cdiv(batch, 2), SUBLANE)

    padded_batch = _round_up(batch, tb)
    if padded_batch != batch:
        x = jnp.pad(x, ((0, padded_batch - batch), (0, 0)))
    grid = (padded_batch // tb,)

    def resident(shape):  # weights/biases: same block for every grid step
        return pl.BlockSpec(shape, lambda i: (0, 0))

    out = pl.pallas_call(
        _mlp_kernel,
        out_shape=jax.ShapeDtypeStruct((padded_batch, out_dim), jnp.float32),
        grid=grid,
        in_specs=[
            pl.BlockSpec((tb, in_dim), lambda i: (i, 0)),  # streamed x tiles
            resident(w1.shape), resident(b1.shape),
            resident(w2.shape), resident(b2.shape),
            resident(w3.shape), resident(b3.shape),
        ],
        out_specs=pl.BlockSpec((tb, out_dim), lambda i: (i, 0)),  # narrow, no padding
        compiler_params=pltpu.CompilerParams(
            dimension_semantics=("parallel",),
            vmem_limit_bytes=int(budget),
        ),
    )(x, w1, b1, w2, b2, w3, b3)
    return out if padded_batch == batch else out[:batch]


def init_params(key, hidden_sizes=(32, 32), output_size=2, in_features=4):
    """Deterministic init mimicking PyTorch Linear default: U(-1/sqrt(fan_in), +1/sqrt(fan_in))."""
    params = {}
    sizes = [in_features] + list(hidden_sizes) + [output_size]
    names = ["l1", "l2", "l3"]
    for name, fan_in, fan_out in zip(names, sizes[:-1], sizes[1:]):
        key, kw, kb = jax.random.split(key, 3)
        bound = 1.0 / jnp.sqrt(jnp.float32(fan_in))
        w = jax.random.uniform(kw, (fan_out, fan_in), jnp.float32, -bound, bound)
        b = jax.random.uniform(kb, (fan_out,), jnp.float32, -bound, bound)
        params[name] = (w, b)
    return params


def reference_forward(x, params):
    """Pure-JAX reference matching the PyTorch module."""
    (w1, b1), (w2, b2), (w3, b3) = params["l1"], params["l2"], params["l3"]
    h = jnp.maximum(x @ w1.T + b1, 0.0)
    h = jnp.maximum(h @ w2.T + b2, 0.0)
    return h @ w3.T + b3


# TODO(synk): get_optimizer (Adam training step) is host-side optimizer state, not a
# forward-pass kernel; intentionally not implemented in Pallas.

if __name__ == "__main__":
    key = jax.random.PRNGKey(0)
    key, kx1, kx2, kx3 = jax.random.split(key, 4)

    hidden_sizes = (32, 32)
    output_size = 2  # CartPole action logits

    params = init_params(key, hidden_sizes, output_size)
    prep = prepare_params(params)  # one-time transpose + lane padding

    # Small batch (single tile).
    batch = 8
    x = jax.random.normal(kx1, (batch, 4), dtype=jnp.float32)
    out = jax.block_until_ready(build_network_forward(x, prep))
    ref = reference_forward(x, params)
    assert out.shape == (batch, output_size)
    assert jnp.allclose(out, ref, atol=1e-5, rtol=1e-5), "mismatch vs reference (batch=8)"

    # Non-multiple-of-8 batch AND non-multiple-of-8 block_batch: exercises the
    # rounding fix and the multi-step pipelined grid.
    batch2 = 300
    x2 = jax.random.normal(kx2, (batch2, 4), dtype=jnp.float32)
    out2 = jax.block_until_ready(build_network_forward(x2, prep, block_batch=100))
    ref2 = reference_forward(x2, params)
    assert out2.shape == (batch2, output_size)
    assert jnp.allclose(out2, ref2, atol=1e-5, rtol=1e-5), "mismatch vs reference (batch=300)"

    # Default (large) block_batch: a single-tile batch gets split into >=2 parallel
    # grid steps (v7x dual-TC path).
    batch3 = 512
    x3 = jax.random.normal(kx3, (batch3, 4), dtype=jnp.float32)
    out3 = jax.block_until_ready(build_network_forward(x3, prep))
    ref3 = reference_forward(x3, params)
    assert out3.shape == (batch3, output_size)
    assert jnp.allclose(out3, ref3, atol=1e-5, rtol=1e-5), "mismatch vs reference (batch=512)"

    print("KERNEL_OK")
</pallas_src>

<mosaic_0001>
module attributes {stable_mosaic.version = 11 : i64} {
  func.func @_mlp_kernel(%arg0: i32, %arg1: memref<8x4xf32, #tpu.memory_space<vmem>>, %arg2: memref<4x128xf32, #tpu.memory_space<vmem>>, %arg3: memref<1x128xf32, #tpu.memory_space<vmem>>, %arg4: memref<128x128xf32, #tpu.memory_space<vmem>>, %arg5: memref<1x128xf32, #tpu.memory_space<vmem>>, %arg6: memref<128x128xf32, #tpu.memory_space<vmem>>, %arg7: memref<1x128xf32, #tpu.memory_space<vmem>>, %arg8: memref<8x2xf32, #tpu.memory_space<vmem>>) attributes {dimension_semantics = [#tpu.dimension_semantics<parallel>], iteration_bounds = array<i64: 1>, scalar_prefetch = 0 : i64, scratch_operands = 0 : i64, tpu.core_type = #tpu.core_type<tc>, window_params = [{transform_indices = @transform_0, window_bounds = array<i64: 8, 4>}, {pipeline_mode = #tpu.pipeline_mode<synchronous>, transform_indices = @transform_1, window_bounds = array<i64: 4, 128>}, {pipeline_mode = #tpu.pipeline_mode<synchronous>, transform_indices = @transform_2, window_bounds = array<i64: 1, 128>}, {pipeline_mode = #tpu.pipeline_mode<synchronous>, transform_indices = @transform_3, window_bounds = array<i64: 128, 128>}, {pipeline_mode = #tpu.pipeline_mode<synchronous>, transform_indices = @transform_4, window_bounds = array<i64: 1, 128>}, {pipeline_mode = #tpu.pipeline_mode<synchronous>, transform_indices = @transform_5, window_bounds = array<i64: 128, 128>}, {pipeline_mode = #tpu.pipeline_mode<synchronous>, transform_indices = @transform_6, window_bounds = array<i64: 1, 128>}, {transform_indices = @transform_7, window_bounds = array<i64: 8, 2>}]} {
    %c0 = arith.constant 0 : index
    %c0_0 = arith.constant 0 : index
    %0 = vector.load %arg1[%c0, %c0_0] : memref<8x4xf32, #tpu.memory_space<vmem>>, vector<8x4xf32>
    %c0_1 = arith.constant 0 : index
    %c0_2 = arith.constant 0 : index
    %1 = vector.load %arg2[%c0_1, %c0_2] : memref<4x128xf32, #tpu.memory_space<vmem>>, vector<4x128xf32>
    %cst = arith.constant dense<0.000000e+00> : vector<8x128xf32>
    %2 = tpu.matmul %0, %1, %cst {dimension_numbers = #tpu.dot_dimension_numbers<[1], [0], [0], [1], [0, 0, 1, 1], [], []>} : vector<8x4xf32>, vector<4x128xf32>, vector<8x128xf32> -> vector<8x128xf32>
    %c0_3 = arith.constant 0 : index
    %c0_4 = arith.constant 0 : index
    %3 = vector.load %arg3[%c0_3, %c0_4] : memref<1x128xf32, #tpu.memory_space<vmem>>, vector<1x128xf32>
    %4 = vector.broadcast %3 : vector<1x128xf32> to vector<8x128xf32>
    %5 = arith.addf %2, %4 : vector<8x128xf32>
    %cst_5 = arith.constant 0.000000e+00 : f32
    %6 = vector.broadcast %cst_5 : f32 to vector<8x128xf32>
    %7 = arith.maximumf %5, %6 : vector<8x128xf32>
    %c0_6 = arith.constant 0 : index
    %c0_7 = arith.constant 0 : index
    %8 = vector.load %arg4[%c0_6, %c0_7] : memref<128x128xf32, #tpu.memory_space<vmem>>, vector<128x128xf32>
    %cst_8 = arith.constant dense<0.000000e+00> : vector<8x128xf32>
    %9 = tpu.matmul %7, %8, %cst_8 {dimension_numbers = #tpu.dot_dimension_numbers<[1], [0], [0], [1], [0, 0, 1, 1], [], []>} : vector<8x128xf32>, vector<128x128xf32>, vector<8x128xf32> -> vector<8x128xf32>
    %c0_9 = arith.constant 0 : index
    %c0_10 = arith.constant 0 : index
    %10 = vector.load %arg5[%c0_9, %c0_10] : memref<1x128xf32, #tpu.memory_space<vmem>>, vector<1x128xf32>
    %11 = vector.broadcast %10 : vector<1x128xf32> to vector<8x128xf32>
    %12 = arith.addf %9, %11 : vector<8x128xf32>
    %cst_11 = arith.constant 0.000000e+00 : f32
    %13 = vector.broadcast %cst_11 : f32 to vector<8x128xf32>
    %14 = arith.maximumf %12, %13 : vector<8x128xf32>
    %c0_12 = arith.constant 0 : index
    %c0_13 = arith.constant 0 : index
    %15 = vector.load %arg6[%c0_12, %c0_13] : memref<128x128xf32, #tpu.memory_space<vmem>>, vector<128x128xf32>
    %cst_14 = arith.constant dense<0.000000e+00> : vector<8x128xf32>
    %16 = tpu.matmul %14, %15, %cst_14 {dimension_numbers = #tpu.dot_dimension_numbers<[1], [0], [0], [1], [0, 0, 1, 1], [], []>} : vector<8x128xf32>, vector<128x128xf32>, vector<8x128xf32> -> vector<8x128xf32>
    %c0_15 = arith.constant 0 : index
    %c0_16 = arith.constant 0 : index
    %17 = vector.load %arg7[%c0_15, %c0_16] : memref<1x128xf32, #tpu.memory_space<vmem>>, vector<1x128xf32>
    %18 = vector.broadcast %17 : vector<1x128xf32> to vector<8x128xf32>
    %19 = arith.addf %16, %18 : vector<8x128xf32>
    %20 = vector.extract_strided_slice %19 {offsets = [0, 0], sizes = [8, 2], strides = [1, 1]} : vector<8x128xf32> to vector<8x2xf32>
    %c0_17 = arith.constant 0 : index
    %c0_18 = arith.constant 0 : index
    %21 = vector.load %arg8[%c0_17, %c0_18] : memref<8x2xf32, #tpu.memory_space<vmem>>, vector<8x2xf32>
    tpu.vector_store %arg8[%c0_17, %c0_18], %20 {strides = array<i32>} : memref<8x2xf32, #tpu.memory_space<vmem>>, vector<8x2xf32>,
    return
  }
  func.func @transform_0(%arg0: i32) -> (i32, i32) {
    %c0_i32 = arith.constant 0 : i32
    %c0_i32_0 = arith.constant 0 : i32
    return %arg0, %c0_i32 : i32, i32
  }
  func.func @transform_1(%arg0: i32) -> (i32, i32) {
    %c0_i32 = arith.constant 0 : i32
    %c0_i32_0 = arith.constant 0 : i32
    %c0_i32_1 = arith.constant 0 : i32
    return %c0_i32, %c0_i32_0 : i32, i32
  }
  func.func @transform_2(%arg0: i32) -> (i32, i32) {
    %c0_i32 = arith.constant 0 : i32
    %c0_i32_0 = arith.constant 0 : i32
    %c0_i32_1 = arith.constant 0 : i32
    return %c0_i32, %c0_i32_0 : i32, i32
  }
  func.func @transform_3(%arg0: i32) -> (i32, i32) {
    %c0_i32 = arith.constant 0 : i32
    %c0_i32_0 = arith.constant 0 : i32
    %c0_i32_1 = arith.constant 0 : i32
    return %c0_i32, %c0_i32_0 : i32, i32
  }
  func.func @transform_4(%arg0: i32) -> (i32, i32) {
    %c0_i32 = arith.constant 0 : i32
    %c0_i32_0 = arith.constant 0 : i32
    %c0_i32_1 = arith.constant 0 : i32
    return %c0_i32, %c0_i32_0 : i32, i32
  }
  func.func @transform_5(%arg0: i32) -> (i32, i32) {
    %c0_i32 = arith.constant 0 : i32
    %c0_i32_0 = arith.constant 0 : i32
    %c0_i32_1 = arith.constant 0 : i32
    return %c0_i32, %c0_i32_0 : i32, i32
  }
  func.func @transform_6(%arg0: i32) -> (i32, i32) {
    %c0_i32 = arith.constant 0 : i32
    %c0_i32_0 = arith.constant 0 : i32
    %c0_i32_1 = arith.constant 0 : i32
    return %c0_i32, %c0_i32_0 : i32, i32
  }
  func.func @transform_7(%arg0: i32) -> (i32, i32) {
    %c0_i32 = arith.constant 0 : i32
    %c0_i32_0 = arith.constant 0 : i32
    return %arg0, %c0_i32 : i32, i32
  }
}

</mosaic_0001>

<bundles_post_ra>
// kernel: tpu_custom_call.1
= control target key start
LH: loop header
LB: loop body
LE: loop exit
PB: predicated region body
PF: predicated region fallthrough
CT: control target
= control target key end

     0   :  { %12 = vsyncpa [#allocation3], 0  ;;  %s612_s0 = inlined_call_operand.vmem [shape: f32[8,4], index: 0, kind: input, shape index: {}]   ;;  %s613_s1 = inlined_call_operand.vmem [shape: f32[4,128], index: 1, kind: input, shape index: {}]   ;;  %s614_s2 = inlined_call_operand.vmem [shape: f32[1,128], index: 2, kind: input, shape index: {}]   ;;  %s615_s3 = inlined_call_operand.hbm [shape: f32[128,128], index: 3, kind: input, shape index: {}]   ;;  %s616_s4 = inlined_call_operand.vmem [shape: f32[1,128], index: 4, kind: input, shape index: {}]   ;;  %s617_s5 = inlined_call_operand.hbm [shape: f32[128,128], index: 5, kind: input, shape index: {}]   ;;  %s618_s6 = inlined_call_operand.vmem [shape: f32[1,128], index: 6, kind: input, shape index: {}]   ;;  %s619_s7 = inlined_call_operand.vmem [shape: f32[8,2], index: 7, kind: output, shape index: {}]  }
   0x1   :  { %13 = vsyncpa [#allocation5], 0  ;;  %s503_s24 = smov [#allocation2]  }
   0x2   :  { %s25_s25 = sshll.u32 %s503_s24, 4  ;;  %s26_s25 = int_to_ptr.vmem [resolvable:$true] %s25_s25 }
   0x3   :  { %s467_s26 = scalar_lea.vmem %s26_s25, 2048  ;;  %p472_p1 = scmp.lt.s32.totalorder %s26_s25, %s26_s25 }
   0x4   :  { %p468_p0 = scmp.ne.s32.totalorder %s26_s25, %s467_s26  ;;  %p473_p2 = scmp.lt.s32.totalorder %s467_s26, %s467_s26 }
   0x6   :  { %p474_p3 = por %p473_p2, %p472_p1 }
   0x8   :  { %p475_p4 = pnand %p474_p3, %p468_p0 }
   0xa   :  { %478 = shalt.err (!%p475_p4)
}
   0xb   :  { %s504_s27 = smov 128   ;;  %s505_s28 = smov 8  }
   0xc   :  { %31 = dma.hbm_to_vmem [thread:$0]  %s615_s3, 2048, %s26_s25, [#allocation3], %s504_s27, %s504_s27, %s505_s28  }
   0xd   :  { %s506_s8 = smov [#allocation4]  }
   0xe   :  { %s39_s9 = sshll.u32 %s506_s8, 4  ;;  %s40_s9 = int_to_ptr.vmem [resolvable:$true] %s39_s9 }
   0xf   :  { %s487_s10 = scalar_lea.vmem %s40_s9, 2048  ;;  %p492_p6 = scmp.lt.s32.totalorder %s40_s9, %s40_s9 }
  0x10   :  { %p488_p5 = scmp.ne.s32.totalorder %s40_s9, %s487_s10  ;;  %p493_p7 = scmp.lt.s32.totalorder %s487_s10, %s487_s10 }
  0x12   :  { %p494_p8 = por %p493_p7, %p492_p6 }
  0x14   :  { %p495_p9 = pnand %p494_p8, %p488_p5 }
  0x16   :  { %498 = shalt.err (!%p495_p9)
}
  0x17   :  { %45 = dma.hbm_to_vmem [thread:$0]  %s617_s5, 2048, %s40_s9, [#allocation5], %s504_s27, %s504_s27, %s505_s28  }
  0x18   :  { %499 = dma.done.wait [#allocation3], 2048  }
  0x19   :  { %500 = vsyncadd [#allocation3], 4294965248 }
  0x1a   :  { %501 = dma.done.wait [#allocation5], 2048  }
  0x1b   :  { %502 = vsyncadd [#allocation5], 4294965248  ;;  %v507_v0 = vmov 0.0   ;;  %vm508_vm0 = vmmov 0   ;;  %vm67_vm1 = vcmask 1043456   ;;  %vm63_vm2 = vcmask 31744  }
  0x1c   :  { %378 = vmatprep.subr.mxu0 %v507_v0  ;;  %380 = vmatprep.mubr.msk.f32.mxu0 %vm508_vm0, %v507_v0  ;;  %v55_v1 = vld [vmem:[%s613_s1] sm:$0xf]  ;;  %v157_v3 = vld [vmem:[#allocation2 + $0x78] sm:$0xff]  ;;  %v156_v4 = vld [vmem:[#allocation2 + $0x70] sm:$0xff]  ;;  %vm329_vm3 = vcmask 15360  }
  0x1d   :  { %383 = vmatprep.subr.mxu1 %v507_v0  ;;  %415 = vmatprep.mubr.msk.f32.mxu1 %vm508_vm0, %v507_v0  ;;  %v54_v2 = vld [vmem:[%s612_s0] sm:$0xff]  ;;  %v155_v5 = vld [vmem:[#allocation2 + $0x68] sm:$0xff]  ;;  %v153_v7 = vld [vmem:[#allocation2 + $0x58] sm:$0xff] }
  0x1e   :  { %379 = vmatpush3.msk.msra.mxu0 %vm67_vm1, %v55_v1  ;;  %384 = vmatpush3.msra.mxu1 %v157_v3  ;;  %v154_v6 = vld [vmem:[#allocation2 + $0x60] sm:$0xff]  ;;  %v152_v8 = vld [vmem:[#allocation2 + $0x50] sm:$0xff]  ;;  %v151_v9 = vld [vmem:[#allocation2 + $0x48] sm:$0xff] }
  0x1f   :  { %381 = vmatmul.mubr.msk.f32.vlgmr.msra.gmra.mxu0 %vm63_vm2, %v54_v2  ;;  %385 = vmatprep.subr.mxu1 %v507_v0  ;;  %v150_v10 = vld [vmem:[#allocation2 + $0x40] sm:$0xff]  ;;  %v149_v11 = vld [vmem:[#allocation2 + $0x38] sm:$0xff]  ;;  %v148_v12 = vld [vmem:[#allocation2 + $0x30] sm:$0xff] }
  0x20   :  { %386 = vmatpush3.msra.mxu1 %v156_v4  ;;  %418 = vmatprep.subr.mxu0 %v507_v0  ;;  %v147_v13 = vld [vmem:[#allocation2 + $0x28] sm:$0xff]  ;;  %v146_v14 = vld [vmem:[#allocation2 + $0x20] sm:$0xff]  ;;  %v145_v15 = vld [vmem:[#allocation2 + $0x18] sm:$0xff] }
  0x21   :  { %387 = vmatprep.subr.mxu1 %v507_v0  ;;  %450 = vmatprep.mubr.msk.f32.mxu0 %vm508_vm0, %v507_v0  ;;  %v144_v16 = vld [vmem:[#allocation2 + $0x10] sm:$0xff]  ;;  %v143_v17 = vld [vmem:[#allocation2 + $0x8] sm:$0xff]  ;;  %v142_v18 = vld [vmem:[#allocation2] sm:$0xff] }
  0x22   :  { %388 = vmatpush3.msra.mxu1 %v155_v5  ;;  %v251_v19 = vld [vmem:[#allocation4 + $0x78] sm:$0xff]  ;;  %v250_v20 = vld [vmem:[#allocation4 + $0x70] sm:$0xff]  ;;  %v249_v21 = vld [vmem:[#allocation4 + $0x68] sm:$0xff] }
  0x23   :  { %389 = vmatprep.subr.mxu1 %v507_v0  ;;  %419 = vmatpush3.msra.mxu0 %v251_v19  ;;  %v248_v22 = vld [vmem:[#allocation4 + $0x60] sm:$0xff]  ;;  %v247_v23 = vld [vmem:[#allocation4 + $0x58] sm:$0xff]  ;;  %v246_v24 = vld [vmem:[#allocation4 + $0x50] sm:$0xff] }
  0x24   :  { %390 = vmatpush3.msra.mxu1 %v154_v6  ;;  %420 = vmatprep.subr.mxu0 %v507_v0  ;;  %v245_v25 = vld [vmem:[#allocation4 + $0x48] sm:$0xff]  ;;  %v244_v26 = vld [vmem:[#allocation4 + $0x40] sm:$0xff]  ;;  %v243_v27 = vld [vmem:[#allocation4 + $0x38] sm:$0xff] }
  0x25   :  { %391 = vmatprep.subr.mxu1 %v507_v0  ;;  %421 = vmatpush3.msra.mxu0 %v250_v20  ;;  %v242_v28 = vld [vmem:[#allocation4 + $0x30] sm:$0xff]  ;;  %v241_v29 = vld [vmem:[#allocation4 + $0x28] sm:$0xff]  ;;  %v240_v30 = vld [vmem:[#allocation4 + $0x20] sm:$0xff] }
  0x26   :  { %392 = vmatpush3.msra.mxu1 %v153_v7  ;;  %422 = vmatprep.subr.mxu0 %v507_v0  ;;  %v239_v31 = vld [vmem:[#allocation4 + $0x18] sm:$0xff]  ;;  %v337_v32 = vld [vmem:[%s614_s2] ss:$0 sm:$0xff]  ;;  %v238_v37 = vld [vmem:[#allocation4 + $0x10] sm:$0xff] }
  0x27   :  { %393 = vmatprep.subr.mxu1 %v507_v0  ;;  %423 = vmatpush3.msra.mxu0 %v249_v21  ;;  %v237_v38 = vld [vmem:[#allocation4 + $0x8] sm:$0xff]  ;;  %v236_v39 = vld [vmem:[#allocation4] sm:$0xff] }
  0x28   :  { %394 = vmatpush3.msra.mxu1 %v152_v8  ;;  %424 = vmatprep.subr.mxu0 %v507_v0  ;;  %v340_v40 = vld [vmem:[%s616_s4] ss:$0 sm:$0xff] }
  0x29   :  { %395 = vmatprep.subr.mxu1 %v507_v0  ;;  %425 = vmatpush3.msra.mxu0 %v248_v22  ;;  %v341_v45 = vld [vmem:[%s618_s6] ss:$0 sm:$0xff] }
  0x2a   :  { %396 = vmatpush3.msra.mxu1 %v151_v9  ;;  %426 = vmatprep.subr.mxu0 %v507_v0 }
  0x2b   :  { %397 = vmatprep.subr.mxu1 %v507_v0  ;;  %427 = vmatpush3.msra.mxu0 %v247_v23 }
  0x2c   :  { %398 = vmatpush3.msra.mxu1 %v150_v10  ;;  %428 = vmatprep.subr.mxu0 %v507_v0 }
  0x2d   :  { %399 = vmatprep.subr.mxu1 %v507_v0  ;;  %429 = vmatpush3.msra.mxu0 %v246_v24 }
  0x2e   :  { %400 = vmatpush3.msra.mxu1 %v149_v11  ;;  %430 = vmatprep.subr.mxu0 %v507_v0 }
  0x2f   :  { %401 = vmatprep.subr.mxu1 %v507_v0  ;;  %431 = vmatpush3.msra.mxu0 %v245_v25 }
  0x30   :  { %402 = vmatpush3.msra.mxu1 %v148_v12  ;;  %432 = vmatprep.subr.mxu0 %v507_v0 }
  0x31   :  { %403 = vmatprep.subr.mxu1 %v507_v0  ;;  %433 = vmatpush3.msra.mxu0 %v244_v26 }
  0x32   :  { %404 = vmatpush3.msra.mxu1 %v147_v13  ;;  %434 = vmatprep.subr.mxu0 %v507_v0 }
  0x33   :  { %405 = vmatprep.subr.mxu1 %v507_v0  ;;  %435 = vmatpush3.msra.mxu0 %v243_v27 }
  0x34   :  { %406 = vmatpush3.msra.mxu1 %v146_v14  ;;  %436 = vmatprep.subr.mxu0 %v507_v0 }
  0x35   :  { %407 = vmatprep.subr.mxu1 %v507_v0  ;;  %437 = vmatpush3.msra.mxu0 %v242_v28 }
  0x36   :  { %408 = vmatpush3.msra.mxu1 %v145_v15  ;;  %438 = vmatprep.subr.mxu0 %v507_v0 }
  0x37   :  { %409 = vmatprep.subr.mxu1 %v507_v0  ;;  %439 = vmatpush3.msra.mxu0 %v241_v29 }
  0x38   :  { %410 = vmatpush3.msra.mxu1 %v144_v16  ;;  %440 = vmatprep.subr.mxu0 %v507_v0 }
  0x39   :  { %411 = vmatprep.subr.mxu1 %v507_v0  ;;  %441 = vmatpush3.msra.mxu0 %v240_v30 }
  0x3a   :  { %412 = vmatpush3.msra.mxu1 %v143_v17  ;;  %442 = vmatprep.subr.mxu0 %v507_v0 }
  0x3b   :  { %413 = vmatprep.subr.mxu1 %v507_v0  ;;  %443 = vmatpush3.msra.mxu0 %v239_v31 }
  0x3c   :  { %414 = vmatpush3.msra.mxu1 %v142_v18  ;;  %444 = vmatprep.subr.mxu0 %v507_v0 }
  0x3d   :  { %445 = vmatpush3.msra.mxu0 %v238_v37 }
  0x3e   :  { %446 = vmatprep.subr.mxu0 %v507_v0 }
  0x3f   :  { %447 = vmatpush3.msra.mxu0 %v237_v38 }
  0x40   :  { %448 = vmatprep.subr.mxu0 %v507_v0 }
  0x41   :  { %449 = vmatpush3.msra.mxu0 %v236_v39 }
  0xdf   :  { %v137_v33 = vpop.f32.mrf.mxu0 }
  0xe0   :  { %v138_v34 = vadd.f32 %v337_v32, %v137_v33 }
  0xe1   :  { %v382_v35 = vpop.f32.mrf.mxu0 }
  0xe2   :  { %v141_v36 = vmax.f32 %v138_v34, 0.0 }
  0xe4   :  { %416 = vmatmul.mubr.f32.vlgmr.msra.gmra.mxu1 %v141_v36 }
 0x1a4   :  { %v231_v41 = vpop.f32.mrf.mxu1 }
 0x1a5   :  { %v232_v42 = vadd.f32 %v340_v40, %v231_v41 }
 0x1a6   :  { %v417_v43 = vpop.f32.mrf.mxu1 }
 0x1a7   :  { %v235_v44 = vmax.f32 %v232_v42, 0.0 }
 0x1a9   :  { %451 = vmatmul.mubr.f32.vlgmr.msra.gmra.mxu0 %v235_v44 }
 0x269   :  { %v325_v46 = vpop.f32.mrf.mxu0 }
 0x26a   :  { %v326_v47 = vadd.f32 %v341_v45, %v325_v46 }
 0x26b   :  { %v452_v48 = vpop.f32.mrf.mxu0 }
 0x26c   :  { %330 = vst.msk [vmem:[%s619_s7] sm:$0xff] %vm329_vm3, %v326_v47 }
 0x26d   :  { %335 = vsyncpa [#allocation3], 1 }
 0x26e   :  { %336 = vsyncpa [#allocation5], 1 }

</bundles_post_ra>
